<compile_context>
chip_gen: v6e
topology: v6e:2x2x1
jax: 0.10.0
libtpu: 0.0.40
codegen_flags: <defaults>
</compile_context>

<pallas_src>
import sys
import math
from functools import partial, lru_cache
from collections import namedtuple

import jax
import jax.numpy as jnp
from jax.experimental import pallas as pl
from jax.experimental.pallas import tpu as pltpu


def _round_up(x, m):
    return ((x + m - 1) // m) * m


def _pad_to(a, rows, cols):
    pr, pc = rows - a.shape[0], cols - a.shape[1]
    if pr == 0 and pc == 0:
        return a
    return jnp.pad(a, ((0, pr), (0, pc)))


@lru_cache(maxsize=1)
def _feature_align():
    """256 for 2x256x256 MXU generations (v6e/v7x), 128 otherwise (v5e/v4/...)."""
    try:
        kind = jax.devices()[0].device_kind.lower()
    except Exception:
        return 128
    return 256 if ("v6" in kind or "v7" in kind) else 128


# ----------------------------------------------------------------------------
# Pallas kernel 1: fused MLP forward  (x @ W1 + b1 -> relu -> @ W2 + b2)
# ----------------------------------------------------------------------------
def _mlp_kernel(x_ref, w1_ref, b1_ref, w2_ref, b2_ref, o_ref):
    # bf16 operands, f32 accumulation on the MXU.
    h = jnp.dot(x_ref[...], w1_ref[...], preferred_element_type=jnp.float32)
    h = jnp.maximum(h + b1_ref[...], 0.0).astype(w2_ref.dtype)
    y = jnp.dot(h, w2_ref[...], preferred_element_type=jnp.float32)
    o_ref[...] = (y + b2_ref[...]).astype(o_ref.dtype)


def _mlp_pallas(x_p, w1_p, b1_p, w2_p, b2_p, tb, tn, out_dtype):
    B_p, Din_p = x_p.shape
    H_p = w1_p.shape[1]
    Dout_p = w2_p.shape[1]
    grid = (B_p // tb, Dout_p // tn)

    flops = 2 * B_p * (Din_p * H_p + H_p * Dout_p)
    bytes_accessed = int(
        x_p.size * x_p.dtype.itemsize
        + w1_p.size * w1_p.dtype.itemsize
        + b1_p.size * b1_p.dtype.itemsize
        + w2_p.size * w2_p.dtype.itemsize
        + b2_p.size * b2_p.dtype.itemsize
        + B_p * Dout_p * jnp.dtype(out_dtype).itemsize)

    # TODO(synk): for non-toy weight sizes add a K-reduction grid axis (tile
    # Din/H at 256-512, "arbitrary", f32 VMEM accumulator with pl.when
    # init/finalize) so resident weights stay within v7x's 64 MiB VMEM.
    return pl.pallas_call(
        _mlp_kernel,
        out_shape=jax.ShapeDtypeStruct((B_p, Dout_p), out_dtype),
        grid_spec=pl.GridSpec(
            grid=grid,
            in_specs=[
                pl.BlockSpec((tb, Din_p), lambda i, j: (i, 0)),
                pl.BlockSpec((Din_p, H_p), lambda i, j: (0, 0)),
                pl.BlockSpec((1, H_p), lambda i, j: (0, 0)),
                pl.BlockSpec((H_p, tn), lambda i, j: (0, j)),
                pl.BlockSpec((1, tn), lambda i, j: (0, j)),
            ],
            out_specs=pl.BlockSpec((tb, tn), lambda i, j: (i, j)),
        ),
        compiler_params=pltpu.CompilerParams(
            dimension_semantics=("parallel", "parallel"),
            vmem_limit_bytes=32 * 1024 * 1024,
        ),
        cost_estimate=pl.CostEstimate(
            flops=flops, transcendentals=0, bytes_accessed=bytes_accessed),
    )(x_p, w1_p, b1_p, w2_p, b2_p)


@partial(jax.jit, static_argnames=("tb", "tn", "n_out"))
def _mlp_forward_jit(x, w1_p, b1_p, w2_p, b2_p, *, tb, tn, n_out):
    B, Din = x.shape
    Din_p = w1_p.shape[0]
    Dout_p = w2_p.shape[1]
    B_p = _round_up(B, tb)
    x_p = _pad_to(x, B_p, Din_p).astype(w1_p.dtype)
    out = _mlp_pallas(x_p, w1_p, b1_p, w2_p, b2_p, tb, tn, x.dtype)
    if B_p == B and Dout_p == n_out:       # skip slice when no padding was added
        return out
    return out[:B, :n_out]


def _prep_mlp_weights(p):
    """Pad once to MXU-friendly tiles and pre-cast matmul operands to bf16."""
    w1, b1, w2, b2 = p["w1"], p["b1"], p["w2"], p["b2"]
    Din, H = w1.shape
    Dout = w2.shape[1]
    feat = _feature_align()
    Din_p = _round_up(Din, feat)
    H_p = _round_up(H, feat)
    Dout_p = _round_up(Dout, feat)
    tn = min(256, Dout_p)
    Dout_p = _round_up(Dout_p, tn)
    return dict(
        w1=_pad_to(w1, Din_p, H_p).astype(jnp.bfloat16),
        b1=_pad_to(b1.astype(jnp.float32).reshape(1, -1), 1, H_p),
        w2=_pad_to(w2, H_p, Dout_p).astype(jnp.bfloat16),
        b2=_pad_to(b2.astype(jnp.float32).reshape(1, -1), 1, Dout_p),
        tn=tn, n_out=Dout)


def _mlp_apply(x, c):
    B = x.shape[0]
    tb = min(128, _round_up(max(B, 1), 16))    # 16-aligned batch tile (bf16 sublanes)
    return _mlp_forward_jit(x, c["w1"], c["b1"], c["w2"], c["b2"],
                            tb=tb, tn=c["tn"], n_out=c["n_out"])


# ----------------------------------------------------------------------------
# Pallas kernel 2: fused EMA parameter update over the whole packed pytree
#   shadow_new = shadow - (1 - decay) * (shadow - param)
# ----------------------------------------------------------------------------
_LANES = 512            # lane-dense packing width (multiple of 128)
_MAX_BLOCK_ROWS = 2048  # 2048 * 512 * 4 B = 4 MiB per tile per stream
_MIN_SPLIT_ROWS = 512   # only split into >=2 tiles if each tile stays >= 1 MiB

_Layout = namedtuple("_Layout",
                     ["names", "shapes", "dtypes", "sizes", "total", "rows", "block_rows"])


def _ema_update_kernel(decay_ref, shadow_ref, param_ref, out_ref):
    one_minus_d = 1.0 - decay_ref[0]           # scalar in SMEM
    s = shadow_ref[...]
    out_ref[...] = (s - one_minus_d * (s - param_ref[...])).astype(out_ref.dtype)


def _flat_layout(params):
    """Static lane-dense packing layout for a parameter dict."""
    names = tuple(sorted(params.keys()))
    shapes = {k: tuple(params[k].shape) for k in names}
    dtypes = {k: jnp.dtype(params[k].dtype) for k in names}
    sizes = {k: max(1, math.prod(shapes[k])) for k in names}
    total = sum(sizes[k] for k in names)
    rows = max(8, _round_up(pl.cdiv(total, _LANES), 8))
    if rows >= 2 * _MIN_SPLIT_ROWS:
        # Force grid >= 2 (v7x megacore) while tiles stay >=1 MiB and <=4 MiB.
        block_rows = min(_MAX_BLOCK_ROWS, _round_up(pl.cdiv(rows, 2), 8))
        rows = _round_up(rows, block_rows)
    else:
        block_rows = rows
    return _Layout(names, shapes, dtypes, sizes, total, rows, block_rows)


def _pack(params, layout):
    """Pack a param dict into a lane-dense (rows, 512) f32 buffer (done outside
    the EMA-update hot path: only in __init__ / set_params)."""
    flat = jnp.concatenate(
        [jnp.ravel(params[k]).astype(jnp.float32) for k in layout.names])
    pad = layout.rows * _LANES - layout.total
    if pad:
        flat = jnp.pad(flat, (0, pad))
    return flat.reshape(layout.rows, _LANES)


def _unpack(flat2d, layout):
    flat = flat2d.reshape(-1)
    out, off = {}, 0
    for k in layout.names:
        n = layout.sizes[k]
        out[k] = flat[off:off + n].reshape(layout.shapes[k]).astype(layout.dtypes[k])
        off += n
    return out


def _ema_update_packed(shadow2d, param2d, decay, block_rows):
    rows, lanes = shadow2d.shape
    grid = rows // block_rows
    nbytes = shadow2d.size * shadow2d.dtype.itemsize
    decay_arr = jnp.asarray(decay, jnp.float32).reshape(1)
    return pl.pallas_call(
        _ema_update_kernel,
        out_shape=jax.ShapeDtypeStruct(shadow2d.shape, shadow2d.dtype),
        grid_spec=pl.GridSpec(
            grid=(grid,),
            in_specs=[
                pl.BlockSpec(memory_space=pltpu.MemorySpace.SMEM),     # decay scalar
                pl.BlockSpec((block_rows, lanes), lambda i: (i, 0)),   # shadow
                pl.BlockSpec((block_rows, lanes), lambda i: (i, 0)),   # param
            ],
            out_specs=pl.BlockSpec((block_rows, lanes), lambda i: (i, 0)),
        ),
        input_output_aliases={1: 0},      # shadow updated in place
        compiler_params=pltpu.CompilerParams(
            dimension_semantics=("parallel",),
            vmem_limit_bytes=32 * 1024 * 1024,
        ),
        cost_estimate=pl.CostEstimate(
            flops=3 * shadow2d.size, transcendentals=0, bytes_accessed=3 * nbytes),
    )(decay_arr, shadow2d, param2d)


def _make_update_fn(block_rows, base_decay, avg_mode):
    base_decay = float(base_decay)

    def update(shadow2d, param2d, ens_count):
        ens_new = ens_count + 1.0
        if avg_mode:
            # ens_new == 1 -> decay = 0  (shadow := params), matching the spec.
            decay = 1.0 - 1.0 / jnp.maximum(ens_new, 1.0)
        else:
            decay = jnp.where(ens_new <= 1.0, 0.0, jnp.float32(base_decay))
        new_shadow = _ema_update_packed(shadow2d, param2d, decay, block_rows)
        return new_shadow, ens_new

    return jax.jit(update, donate_argnums=(0,))


# ----------------------------------------------------------------------------
# EMA wrapper (same semantics as the PyTorch module)
# ----------------------------------------------------------------------------
class EMA:
    def __init__(self, params, decay, starts_at=0, updates_every=1, ens_mode="avg"):
        self.decay = float(decay)
        self.ens_mode = ens_mode
        self.starts_at = starts_at
        self.updates_every = updates_every
        self.count = 0
        self.ens_count = 0.0            # host mirror (book-keeping only)
        self.training = True

        self._layout = _flat_layout(params)
        self.params = dict(params)                      # "model" parameters
        self.param_flat = _pack(self.params, self._layout)
        self.shadow_flat = jnp.array(self.param_flat)   # deepcopy of the model
        self._ens_count_dev = jnp.zeros((), jnp.float32)

        self._shadow_cache = None       # unpacked shadow dict
        self._model_fwd_cache = None    # pre-padded bf16 weights (training fwd)
        self._shadow_fwd_cache = None   # pre-padded bf16 weights (eval fwd)

        self._update_fn = _make_update_fn(
            self._layout.block_rows, self.decay, ens_mode == "avg")

    # -- parameter management -------------------------------------------------
    def set_params(self, params):
        """Install new model params (e.g. after an optimizer step).  Packing
        happens here, once per training step, NOT inside the update() hot path."""
        self.params = dict(params)
        self.param_flat = _pack(self.params, self._layout)
        self._model_fwd_cache = None

    @property
    def shadow(self):
        if self._shadow_cache is None:
            self._shadow_cache = _unpack(self.shadow_flat, self._layout)
        return self._shadow_cache

    # -- train / eval mode ----------------------------------------------------
    def train(self):
        self.training = True
        return self

    def eval(self):
        self.training = False
        return self

    # -- EMA update -----------------------------------------------------------
    def update(self):
        if self.count < self.starts_at:
            self.count += 1
            return
        elif self.count % self.updates_every != 0:
            self.count += 1
            return
        self.count += 1
        self.ens_count += 1.0
        if not self.training:
            print("EMA update should only be called during training",
                  file=sys.stderr, flush=True)
            self._ens_count_dev = self._ens_count_dev + 1.0   # keep device count in sync
            return
        # Fused in-place update over the whole packed pytree; decay computed on
        # device from the device-resident ens_count (no host->device scalar).
        self.shadow_flat, self._ens_count_dev = self._update_fn(
            self.shadow_flat, self.param_flat, self._ens_count_dev)
        self._shadow_cache = None
        self._shadow_fwd_cache = None
        # TODO(synk): named_buffers copy skipped — the toy MLP model has no buffers.

    # -- forward --------------------------------------------------------------
    def forward(self, x):
        if self.training:
            if self._model_fwd_cache is None:
                self._model_fwd_cache = _prep_mlp_weights(self.params)
            cache = self._model_fwd_cache
        else:
            if self._shadow_fwd_cache is None:
                self._shadow_fwd_cache = _prep_mlp_weights(self.shadow)
            cache = self._shadow_fwd_cache
        return _mlp_apply(x, cache)

    __call__ = forward


def _mlp_ref(x, p):
    h = jnp.maximum(x @ p["w1"] + p["b1"], 0.0)
    return h @ p["w2"] + p["b2"]


if __name__ == "__main__":
    key = jax.random.PRNGKey(0)
    B, Din, H, Dout = 8, 32, 32, 32

    k1, k2, k3, k4, kx, kd = jax.random.split(key, 6)
    params = {
        "w1": jax.random.normal(k1, (Din, H), jnp.float32) * 0.1,
        "b1": jax.random.normal(k2, (H,), jnp.float32) * 0.01,
        "w2": jax.random.normal(k3, (H, Dout), jnp.float32) * 0.1,
        "b2": jax.random.normal(k4, (Dout,), jnp.float32) * 0.01,
    }
    x = jax.random.normal(kx, (B, Din), jnp.float32)

    ema = EMA(params, decay=0.999, starts_at=0, updates_every=1, ens_mode="avg")

    # --- training mode: forward uses model params (bf16 MXU operands) ---
    ema.train()
    y_train = ema(x)
    jax.block_until_ready(y_train)
    assert jnp.allclose(y_train, _mlp_ref(x, ema.params), atol=2e-2, rtol=2e-2)

    # --- EMA update #1 (ens_count==1 -> shadow := params) ---
    ema.update()
    sh = ema.shadow
    for k in params:
        assert jnp.allclose(sh[k], ema.params[k], atol=1e-6)

    # simulate a training step changing the model params, then update again
    old_params = {k: jnp.array(v) for k, v in ema.params.items()}
    new_params = dict(ema.params)
    new_params["w1"] = new_params["w1"] + jax.random.normal(kd, (Din, H), jnp.float32) * 0.05
    ema.set_params(new_params)
    ema.update()  # ens_count==2, avg mode -> decay = 0.5
    expected_w1 = old_params["w1"] - (1.0 - 0.5) * (old_params["w1"] - new_params["w1"])
    assert jnp.allclose(ema.shadow["w1"], expected_w1, atol=1e-5)

    # --- eval mode: forward uses shadow params ---
    ema.eval()
    y_eval = ema(x)
    jax.block_until_ready(y_eval)
    assert jnp.allclose(y_eval, _mlp_ref(x, ema.shadow), atol=2e-2, rtol=2e-2)

    jax.block_until_ready(ema.shadow_flat)
    print("KERNEL_OK")
</pallas_src>

<mosaic_0001>
module attributes {stable_mosaic.version = 11 : i64} {
  func.func @_mlp_kernel(%arg0: i32, %arg1: i32, %arg2: memref<16x128xbf16, #tpu.memory_space<vmem>>, %arg3: memref<128x128xbf16, #tpu.memory_space<vmem>>, %arg4: memref<1x128xf32, #tpu.memory_space<vmem>>, %arg5: memref<128x128xbf16, #tpu.memory_space<vmem>>, %arg6: memref<1x128xf32, #tpu.memory_space<vmem>>, %arg7: memref<16x128xf32, #tpu.memory_space<vmem>>) attributes {dimension_semantics = [#tpu.dimension_semantics<parallel>, #tpu.dimension_semantics<parallel>], iteration_bounds = array<i64: 1, 1>, scalar_prefetch = 0 : i64, scratch_operands = 0 : i64, tpu.core_type = #tpu.core_type<tc>, window_params = [{transform_indices = @transform_0, window_bounds = array<i64: 16, 128>}, {pipeline_mode = #tpu.pipeline_mode<synchronous>, transform_indices = @transform_1, window_bounds = array<i64: 128, 128>}, {pipeline_mode = #tpu.pipeline_mode<synchronous>, transform_indices = @transform_2, window_bounds = array<i64: 1, 128>}, {transform_indices = @transform_3, window_bounds = array<i64: 128, 128>}, {transform_indices = @transform_4, window_bounds = array<i64: 1, 128>}, {transform_indices = @transform_5, window_bounds = array<i64: 16, 128>}]} {
    %c0 = arith.constant 0 : index
    %c0_0 = arith.constant 0 : index
    %0 = vector.load %arg2[%c0, %c0_0] : memref<16x128xbf16, #tpu.memory_space<vmem>>, vector<16x128xbf16>
    %c0_1 = arith.constant 0 : index
    %c0_2 = arith.constant 0 : index
    %1 = vector.load %arg3[%c0_1, %c0_2] : memref<128x128xbf16, #tpu.memory_space<vmem>>, vector<128x128xbf16>
    %cst = arith.constant dense<0.000000e+00> : vector<16x128xf32>
    %2 = tpu.matmul %0, %1, %cst {dimension_numbers = #tpu.dot_dimension_numbers<[1], [0], [0], [1], [0, 0, 1, 1], [], []>} : vector<16x128xbf16>, vector<128x128xbf16>, vector<16x128xf32> -> vector<16x128xf32>
    %c0_3 = arith.constant 0 : index
    %c0_4 = arith.constant 0 : index
    %3 = vector.load %arg4[%c0_3, %c0_4] : memref<1x128xf32, #tpu.memory_space<vmem>>, vector<1x128xf32>
    %4 = vector.broadcast %3 : vector<1x128xf32> to vector<16x128xf32>
    %5 = arith.addf %2, %4 : vector<16x128xf32>
    %cst_5 = arith.constant 0.000000e+00 : f32
    %6 = vector.broadcast %cst_5 : f32 to vector<16x128xf32>
    %7 = arith.maximumf %5, %6 : vector<16x128xf32>
    %8 = arith.truncf %7 : vector<16x128xf32> to vector<16x128xbf16>
    %c0_6 = arith.constant 0 : index
    %c0_7 = arith.constant 0 : index
    %9 = vector.load %arg5[%c0_6, %c0_7] : memref<128x128xbf16, #tpu.memory_space<vmem>>, vector<128x128xbf16>
    %cst_8 = arith.constant dense<0.000000e+00> : vector<16x128xf32>
    %10 = tpu.matmul %8, %9, %cst_8 {dimension_numbers = #tpu.dot_dimension_numbers<[1], [0], [0], [1], [0, 0, 1, 1], [], []>} : vector<16x128xbf16>, vector<128x128xbf16>, vector<16x128xf32> -> vector<16x128xf32>
    %c0_9 = arith.constant 0 : index
    %c0_10 = arith.constant 0 : index
    %11 = vector.load %arg6[%c0_9, %c0_10] : memref<1x128xf32, #tpu.memory_space<vmem>>, vector<1x128xf32>
    %12 = vector.broadcast %11 : vector<1x128xf32> to vector<16x128xf32>
    %13 = arith.addf %10, %12 : vector<16x128xf32>
    %c0_11 = arith.constant 0 : index
    %c0_12 = arith.constant 0 : index
    %14 = vector.load %arg7[%c0_11, %c0_12] : memref<16x128xf32, #tpu.memory_space<vmem>>, vector<16x128xf32>
    tpu.vector_store %arg7[%c0_11, %c0_12], %13 {strides = array<i32>} : memref<16x128xf32, #tpu.memory_space<vmem>>, vector<16x128xf32>,
    return
  }
  func.func @transform_0(%arg0: i32, %arg1: i32) -> (i32, i32) {
    %c0_i32 = arith.constant 0 : i32
    %c0_i32_0 = arith.constant 0 : i32
    return %arg0, %c0_i32 : i32, i32
  }
  func.func @transform_1(%arg0: i32, %arg1: i32) -> (i32, i32) {
    %c0_i32 = arith.constant 0 : i32
    %c0_i32_0 = arith.constant 0 : i32
    %c0_i32_1 = arith.constant 0 : i32
    return %c0_i32, %c0_i32_0 : i32, i32
  }
  func.func @transform_2(%arg0: i32, %arg1: i32) -> (i32, i32) {
    %c0_i32 = arith.constant 0 : i32
    %c0_i32_0 = arith.constant 0 : i32
    %c0_i32_1 = arith.constant 0 : i32
    return %c0_i32, %c0_i32_0 : i32, i32
  }
  func.func @transform_3(%arg0: i32, %arg1: i32) -> (i32, i32) {
    %c0_i32 = arith.constant 0 : i32
    %c0_i32_0 = arith.constant 0 : i32
    return %c0_i32, %arg1 : i32, i32
  }
  func.func @transform_4(%arg0: i32, %arg1: i32) -> (i32, i32) {
    %c0_i32 = arith.constant 0 : i32
    %c0_i32_0 = arith.constant 0 : i32
    return %c0_i32, %arg1 : i32, i32
  }
  func.func @transform_5(%arg0: i32, %arg1: i32) -> (i32, i32) {
    %c0_i32 = arith.constant 0 : i32
    return %arg0, %arg1 : i32, i32
  }
}

</mosaic_0001>

<bundles_post_ra>
// kernel: _mlp_forward_jit.1
= control target key start
LH: loop header
LB: loop body
LE: loop exit
PB: predicated region body
PF: predicated region fallthrough
CT: control target
= control target key end

     0   :  { %10 = vsyncpa [#allocation3], 0  ;;  %s493_s0 = inlined_call_operand.vmem [shape: bf16[16,128], index: 0, kind: input, shape index: {}]   ;;  %s494_s1 = inlined_call_operand.hbm [shape: bf16[128,128], index: 1, kind: input, shape index: {}]   ;;  %s495_s2 = inlined_call_operand.vmem [shape: f32[1,128], index: 2, kind: input, shape index: {}]   ;;  %s496_s3 = inlined_call_operand.hbm [shape: bf16[128,128], index: 3, kind: input, shape index: {}]   ;;  %s497_s4 = inlined_call_operand.vmem [shape: f32[1,128], index: 4, kind: input, shape index: {}]   ;;  %s498_s5 = inlined_call_operand.vmem [shape: f32[16,128], index: 5, kind: output, shape index: {}]  }
   0x1   :  { %11 = vsyncpa [#allocation5], 0  ;;  %s436_s18 = smov [#allocation2]  }
   0x2   :  { %s19_s19 = sshll.u32 %s436_s18, 4  ;;  %s20_s19 = int_to_ptr.vmem [resolvable:$true] %s19_s19 }
   0x3   :  { %s400_s20 = scalar_lea.vmem %s20_s19, 1024  ;;  %p405_p1 = scmp.lt.s32.totalorder %s20_s19, %s20_s19 }
   0x4   :  { %p401_p0 = scmp.ne.s32.totalorder %s20_s19, %s400_s20  ;;  %p406_p2 = scmp.lt.s32.totalorder %s400_s20, %s400_s20 }
   0x6   :  { %p407_p3 = por %p406_p2, %p405_p1 }
   0x8   :  { %p408_p4 = pnand %p407_p3, %p401_p0 }
   0xa   :  { %411 = shalt.err (!%p408_p4)
}
   0xb   :  { %s437_s21 = smov 64   ;;  %s438_s22 = smov 4  }
   0xc   :  { %25 = dma.hbm_to_vmem [thread:$0]  %s494_s1, 1024, %s20_s19, [#allocation3], %s437_s21, %s437_s21, %s438_s22  }
   0xd   :  { %s439_s25 = smov [#allocation4]  }
   0xe   :  { %s33_s26 = sshll.u32 %s439_s25, 4  ;;  %s34_s26 = int_to_ptr.vmem [resolvable:$true] %s33_s26 }
   0xf   :  { %s420_s27 = scalar_lea.vmem %s34_s26, 1024  ;;  %p425_p6 = scmp.lt.s32.totalorder %s34_s26, %s34_s26 }
  0x10   :  { %p421_p5 = scmp.ne.s32.totalorder %s34_s26, %s420_s27  ;;  %p426_p7 = scmp.lt.s32.totalorder %s420_s27, %s420_s27 }
  0x12   :  { %p427_p8 = por %p426_p7, %p425_p6 }
  0x14   :  { %p428_p9 = pnand %p427_p8, %p421_p5 }
  0x16   :  { %431 = shalt.err (!%p428_p9)
}
  0x17   :  { %39 = dma.hbm_to_vmem [thread:$0]  %s496_s3, 1024, %s34_s26, [#allocation5], %s437_s21, %s437_s21, %s438_s22  }
  0x18   :  { %432 = dma.done.wait [#allocation3], 1024  }
  0x19   :  { %433 = vsyncadd [#allocation3], 4294966272 }
  0x1a   :  { %434 = dma.done.wait [#allocation5], 1024  }
  0x1b   :  { %435 = vsyncadd [#allocation5], 4294966272  ;;  %v440_v0 = vmov 0.0   ;;  %vm441_vm0 = vmmov 0   ;;  %v375_v1 = vld [vmem:[#allocation2 + $0x38] sm:$0xff]   ;;  %v376_v2 = vld [vmem:[#allocation2 + $0x30] sm:$0xff]  }
  0x1c   :  { %329 = vmatprep.subr.bf16.mxu0 %v440_v0  ;;  %345 = vmatprep.mubr.msk.bf16.mxu0 %vm441_vm0, %v440_v0  ;;  %v377_v3 = vld [vmem:[#allocation2 + $0x28] sm:$0xff]   ;;  %v384_v4 = vld [vmem:[#allocation4 + $0x38] sm:$0xff]   ;;  %v378_v5 = vld [vmem:[#allocation2 + $0x20] sm:$0xff]  }
  0x1d   :  { %349 = vmatprep.subr.bf16.mxu1 %v440_v0  ;;  %365 = vmatprep.mubr.msk.bf16.mxu1 %vm441_vm0, %v440_v0  ;;  %v385_v6 = vld [vmem:[#allocation4 + $0x30] sm:$0xff]   ;;  %v379_v7 = vld [vmem:[#allocation2 + $0x18] sm:$0xff]   ;;  %v386_v8 = vld [vmem:[#allocation4 + $0x28] sm:$0xff]  }
  0x1e   :  { %330 = vmatpush3.bf16.msra.mxu0 %v375_v1  ;;  %350 = vmatpush3.bf16.msra.mxu1 %v384_v4  ;;  %v380_v9 = vld [vmem:[#allocation2 + $0x10] sm:$0xff]   ;;  %v387_v10 = vld [vmem:[#allocation4 + $0x20] sm:$0xff]   ;;  %v381_v11 = vld [vmem:[#allocation2 + $0x8] sm:$0xff]  }
  0x1f   :  { %331 = vmatprep.subr.bf16.mxu0 %v440_v0  ;;  %351 = vmatprep.subr.bf16.mxu1 %v440_v0  ;;  %v388_v12 = vld [vmem:[#allocation4 + $0x18] sm:$0xff]   ;;  %v382_v13 = vld [vmem:[#allocation2] sm:$0xff]   ;;  %v389_v15 = vld [vmem:[#allocation4 + $0x10] sm:$0xff]  }
  0x20   :  { %v383_v14 = vld [vmem:[%s493_s0] sm:$0xff]   ;;  %v390_v16 = vld [vmem:[#allocation4 + $0x8] sm:$0xff]  }
  0x21   :  { %v391_v17 = vld [vmem:[#allocation4] sm:$0xff]  }
  0x22   :  { %332 = vmatpush3.bf16.msra.mxu0 %v376_v2  ;;  %352 = vmatpush3.bf16.msra.mxu1 %v385_v6  ;;  %v292_v18 = vld [vmem:[%s495_s2] ss:$0 sm:$0xff] }
  0x23   :  { %333 = vmatprep.subr.bf16.mxu0 %v440_v0  ;;  %353 = vmatprep.subr.bf16.mxu1 %v440_v0  ;;  %v302_v28 = vld [vmem:[%s497_s4] ss:$0 sm:$0xff] }
  0x26   :  { %334 = vmatpush3.bf16.msra.mxu0 %v377_v3  ;;  %354 = vmatpush3.bf16.msra.mxu1 %v386_v8 }
  0x27   :  { %335 = vmatprep.subr.bf16.mxu0 %v440_v0  ;;  %355 = vmatprep.subr.bf16.mxu1 %v440_v0 }
  0x2a   :  { %336 = vmatpush3.bf16.msra.mxu0 %v378_v5  ;;  %356 = vmatpush3.bf16.msra.mxu1 %v387_v10 }
  0x2b   :  { %337 = vmatprep.subr.bf16.mxu0 %v440_v0  ;;  %357 = vmatprep.subr.bf16.mxu1 %v440_v0 }
  0x2e   :  { %338 = vmatpush3.bf16.msra.mxu0 %v379_v7  ;;  %358 = vmatpush3.bf16.msra.mxu1 %v388_v12 }
  0x2f   :  { %339 = vmatprep.subr.bf16.mxu0 %v440_v0  ;;  %359 = vmatprep.subr.bf16.mxu1 %v440_v0 }
  0x32   :  { %340 = vmatpush3.bf16.msra.mxu0 %v380_v9  ;;  %360 = vmatpush3.bf16.msra.mxu1 %v389_v15 }
  0x33   :  { %341 = vmatprep.subr.bf16.mxu0 %v440_v0  ;;  %361 = vmatprep.subr.bf16.mxu1 %v440_v0 }
  0x36   :  { %342 = vmatpush3.bf16.msra.mxu0 %v381_v11  ;;  %362 = vmatpush3.bf16.msra.mxu1 %v390_v16 }
  0x37   :  { %343 = vmatprep.subr.bf16.mxu0 %v440_v0  ;;  %363 = vmatprep.subr.bf16.mxu1 %v440_v0 }
  0x3a   :  { %344 = vmatpush3.bf16.msra.mxu0 %v382_v13  ;;  %364 = vmatpush3.bf16.msra.mxu1 %v391_v17 }
  0x3d   :  { %346 = vmatmul.mubr.bf16.vlgmr.msra.gmra.mxu0 %v383_v14 }
  0xfd   :  { %v162_v19 = vpop.f32.mrf.mxu0 }
  0xfe   :  { %v163_v21 = vadd.f32 %v292_v18, %v162_v19 }
  0xff   :  { %v347_v20 = vpop.f32.mrf.mxu0 }
 0x100   :  { %v169_v25 = vmax.f32 %v163_v21, 0.0 }
 0x101   :  { %v165_v22 = vpop.f32.mrf.mxu0 }
 0x102   :  { %v166_v23 = vadd.f32 %v292_v18, %v165_v22 }
 0x103   :  { %v348_v24 = vpop.f32.mrf.mxu0 }
 0x104   :  { %v170_v26 = vmax.f32 %v166_v23, 0.0 }
 0x106   :  { %v171_v27 = vpack.c.bf16 %v170_v26, %v169_v25 }
 0x108   :  { %366 = vmatmul.mubr.bf16.vlgmr.msra.gmra.mxu1 %v171_v27 }
 0x1c8   :  { %v277_v29 = vpop.f32.mrf.mxu1 }
 0x1c9   :  { %v278_v30 = vadd.f32 %v302_v28, %v277_v29 }
 0x1ca   :  { %v367_v31 = vpop.f32.mrf.mxu1 }
 0x1cb   :  { %284 = vst [vmem:[%s498_s5] sm:$0xff] %v278_v30 }
 0x1cc   :  { %v280_v32 = vpop.f32.mrf.mxu1 }
 0x1cd   :  { %v281_v33 = vadd.f32 %v302_v28, %v280_v32 }
 0x1ce   :  { %v368_v34 = vpop.f32.mrf.mxu1 }
 0x1cf   :  { %285 = vst [vmem:[%s498_s5 + $0x8] sm:$0xff] %v281_v33 }
 0x1d0   :  { %290 = vsyncpa [#allocation3], 1 }
 0x1d1   :  { %291 = vsyncpa [#allocation5], 1 }

</bundles_post_ra>
